<compile_context>
chip_gen: v5e
topology: v5e:2x2
jax: 0.10.0
libtpu: 0.0.40
codegen_flags: <defaults>
</compile_context>

<pallas_src>
import jax
import jax.numpy as jnp
from jax.experimental import pallas as pl
from jax.experimental.pallas import tpu as pltpu


def _round_up(n, m):
    return ((n + m - 1) // m) * m


def _tpu_vmem_and_tm():
    """Per-generation defaults: (tm_default, vmem_limit_bytes)."""
    try:
        info = pltpu.get_tpu_info()
        vmem_cap = int(getattr(info, "vmem_capacity_bytes", 0)) or 64 * 1024 * 1024
    except Exception:
        vmem_cap = 64 * 1024 * 1024            # conservative: valid on every generation
    if vmem_cap <= 64 * 1024 * 1024:
        # v7x-class TensorCore (64 MiB physical): leave headroom, moderate row tile.
        return 512, min(int(vmem_cap * 0.8), 52 * 1024 * 1024)
    # v5e / v6e (128 MiB physical): big row tile to amortize the weight stream.
    return 1024, min(int(vmem_cap * 0.8), 100 * 1024 * 1024)


def _vmem_estimate(tm, tf, Cp, act_bytes, out_bytes, w_bytes):
    """Deliberate VMEM accounting, including the (tm, tf) f32 `h` intermediate."""
    est = 0
    est += 2 * tm * Cp * act_bytes          # x tile, double-buffered
    est += 2 * tm * Cp * out_bytes          # out tile, double-buffered
    est += 2 * 8 * Cp * act_bytes           # prev-row slab, double-buffered
    est += 2 * Cp * 4                       # x_k
    est += 2 * 2 * Cp * tf * w_bytes        # Wk^T + Wv^T tiles, double-buffered
    est += tm * Cp * 2                      # k scratch (bf16)
    est += tm * Cp * 4                      # f32 output accumulator
    est += tm * tf * (4 + 2)                # h intermediate (f32 + bf16 copy)
    return est


def _cmix_kernel(xk_ref, x_ref, prev_ref, wk_ref, wv_ref, o_ref, k_sc, acc_sc):
    """Grid = (B, T_tiles, F_tiles); F is the innermost (reduction) axis."""
    f = pl.program_id(2)

    # Mix + token shift computed once per (b, j) tile, reused across all F steps.
    @pl.when(f == 0)
    def _init():
        x = x_ref[0].astype(jnp.float32)                              # (tm, Cp) f32
        # last row of the previous T-tile (zeros for the first tile of a batch)
        prev_row = prev_ref[...][0, 0, 0:1, :].astype(jnp.float32)    # (1, Cp)
        # token shift: row i <- row i-1; row 0 <- prev_row (XLU roll + VPU select)
        xs = pltpu.roll(x, shift=1, axis=0)
        row0 = jax.lax.broadcasted_iota(jnp.int32, x.shape, 0) == 0
        xs = jnp.where(row0, prev_row, xs)
        xk = xk_ref[...].astype(jnp.float32)                          # (1, Cp)
        k = x + (xs - x) * xk                                         # f32 VPU mix
        k_sc[...] = k.astype(k_sc.dtype)                              # bf16 for the MXU
        acc_sc[...] = jnp.zeros_like(acc_sc)

    # Stream one F-tile of both weights; accumulate into f32 scratch.
    h = jnp.dot(k_sc[...], wk_ref[...],
                preferred_element_type=jnp.float32)                   # (tm, tf) f32
    h = jnp.maximum(h, 0.0)
    h = h * h                                                         # relu(.)**2 in f32
    acc_sc[...] += jnp.dot(h.astype(wv_ref.dtype), wv_ref[...],
                           preferred_element_type=jnp.float32)        # (tm, Cp)

    @pl.when(f == pl.num_programs(2) - 1)
    def _finalize():
        o_ref[0] = acc_sc[...].astype(o_ref.dtype)


def rwkv_cmix_x070(x, x_k, key_w, value_w, *, tm=None, tf=512,
                   mxu_dtype=jnp.bfloat16, act_dtype=jnp.bfloat16,
                   out_dtype=None):
    """x: (B, T, C) f32; x_k: (1, 1, C); key_w: (F, C); value_w: (C, F)."""
    B, T, C = x.shape
    F_dim = key_w.shape[0]
    out_dtype = x.dtype if out_dtype is None else out_dtype

    # Lane-dense padded sizes (multiples of 128).
    Cp = _round_up(C, 128)
    Fp = _round_up(F_dim, 128)

    w_bytes = jnp.dtype(mxu_dtype).itemsize
    act_bytes = jnp.dtype(act_dtype).itemsize
    out_bytes = jnp.dtype(out_dtype).itemsize

    tm_default, vmem_limit = _tpu_vmem_and_tm()
    if tm is None:
        tm = tm_default
    tm = max(8, _round_up(tm, 8))               # (8, 128) block constraint
    tm = min(tm, _round_up(T, 8))               # never larger than the sequence

    # F tile: weight-resident fast path when both weights (double-buffered) fit in
    # about half the VMEM budget -> constant weight index_map, weights DMA'd once.
    tf = max(128, _round_up(min(tf, Fp), 128))
    if 2 * 2 * Cp * Fp * w_bytes <= vmem_limit // 2:
        tf = Fp
    Fp_pad = _round_up(Fp, tf)                  # pad F up rather than shrinking tf
    F_tiles = Fp_pad // tf

    # Shrink tm until the accounted VMEM footprint fits the budget.
    while tm > 8 and _vmem_estimate(tm, tf, Cp, act_bytes, out_bytes, w_bytes) > vmem_limit:
        tm = max(8, _round_up(tm // 2, 8))

    T_pad = _round_up(T, tm)
    T_tiles = T_pad // tm                       # B * T_tiles >= 2 keeps both v7x cores fed

    # Activations: cast to bf16 at the boundary and pad once; zeros are inert.
    x_pad = jnp.pad(x.astype(act_dtype), ((0, 0), (0, T_pad - T), (0, Cp - C)))

    # Per-tile "previous row": last row of the preceding T-tile, zeros for tile 0.
    # Padded to 8 sublanes so its BlockSpec obeys the (8, 128) constraint.
    tile_last = x_pad[:, tm - 1::tm, :]                              # (B, T_tiles, Cp)
    prev = jnp.pad(tile_last, ((0, 0), (1, 0), (0, 0)))[:, :-1, :]   # shift by one tile
    prev8 = jnp.pad(prev[:, :, None, :], ((0, 0), (0, 0), (0, 7), (0, 0)))

    xk2 = jnp.pad(x_k.reshape(1, C), ((0, 0), (0, Cp - C))).astype(jnp.float32)

    # Weights pre-transposed, zero-padded, cast to bf16 for the MXU.
    wk_t = jnp.pad(key_w.T, ((0, Cp - C), (0, Fp_pad - F_dim))).astype(mxu_dtype)   # (Cp, Fp_pad)
    wv_t = jnp.pad(value_w.T, ((0, Fp_pad - F_dim), (0, Cp - C))).astype(mxu_dtype)  # (Fp_pad, Cp)

    weight_passes = 1 if F_tiles == 1 else B * T_tiles
    cost = pl.CostEstimate(
        flops=int(4 * B * T_pad * Cp * Fp_pad),                     # two matmuls
        transcendentals=0,
        bytes_accessed=int(
            x_pad.size * act_bytes + prev8.size * act_bytes + xk2.size * 4
            + (wk_t.size + wv_t.size) * w_bytes * weight_passes
            + B * T_pad * Cp * out_bytes),
    )

    out = pl.pallas_call(
        _cmix_kernel,
        out_shape=jax.ShapeDtypeStruct((B, T_pad, Cp), out_dtype),
        grid_spec=pltpu.PrefetchScalarGridSpec(
            num_scalar_prefetch=0,
            grid=(B, T_tiles, F_tiles),
            in_specs=[
                pl.BlockSpec((1, Cp), lambda b, j, f: (0, 0)),              # x_k
                pl.BlockSpec((1, tm, Cp), lambda b, j, f: (b, j, 0)),       # x tile
                pl.BlockSpec((1, 1, 8, Cp), lambda b, j, f: (b, j, 0, 0)),  # prev row
                pl.BlockSpec((Cp, tf), lambda b, j, f: (0, f)),             # Wk^T F-tile
                pl.BlockSpec((tf, Cp), lambda b, j, f: (f, 0)),             # Wv^T F-tile
            ],
            out_specs=pl.BlockSpec((1, tm, Cp), lambda b, j, f: (b, j, 0)),
            scratch_shapes=[
                pltpu.VMEM((tm, Cp), mxu_dtype),     # k (bf16, reused across F steps)
                pltpu.VMEM((tm, Cp), jnp.float32),   # output accumulator
            ],
        ),
        compiler_params=pltpu.CompilerParams(
            dimension_semantics=("parallel", "parallel", "arbitrary"),
            vmem_limit_bytes=int(vmem_limit),
        ),
        cost_estimate=cost,
    )(xk2, x_pad, prev8, wk_t, wv_t)

    return out[:, :T, :C]


def _reference(x, x_k, key_w, value_w, mxu_dtype=jnp.bfloat16, act_dtype=jnp.bfloat16):
    """Pure-JAX reference mirroring the kernel's bf16-boundary / f32-elementwise math."""
    B, T, C = x.shape
    xa = x.astype(act_dtype).astype(jnp.float32)
    x_shift = jnp.pad(xa, ((0, 0), (1, 0), (0, 0)))[:, :-1, :]
    k = xa + (x_shift - xa) * x_k                                    # f32 mix
    k2 = k.reshape(B * T, C).astype(mxu_dtype)
    h = jnp.dot(k2, key_w.T.astype(mxu_dtype),
                preferred_element_type=jnp.float32)
    h = jnp.maximum(h, 0.0) ** 2                                     # f32
    y = jnp.dot(h.astype(mxu_dtype), value_w.T.astype(mxu_dtype),
                preferred_element_type=jnp.float32)
    return y.reshape(B, T, C).astype(x.dtype)


if __name__ == "__main__":
    # Small shapes consistent with the module: B=2, T=8, n_embd=32, dim_ffn=128
    B, T, C, F_dim = 2, 8, 32, 128

    key = jax.random.PRNGKey(0)
    k1, k2, k3, k4 = jax.random.split(key, 4)

    x = jax.random.normal(k1, (B, T, C), dtype=jnp.float32)
    x_k = jax.random.uniform(k2, (1, 1, C), dtype=jnp.float32)             # self.x_k
    key_w = jax.random.normal(k3, (F_dim, C), dtype=jnp.float32) * 0.05    # key.weight
    value_w = jax.random.normal(k4, (C, F_dim), dtype=jnp.float32) * 0.05  # value.weight

    fwd = jax.jit(rwkv_cmix_x070)
    y = fwd(x, x_k, key_w, value_w)
    jax.block_until_ready(y)

    y_ref = _reference(x, x_k, key_w, value_w)
    assert y.shape == (B, T, C)
    assert jnp.allclose(y, y_ref, atol=2e-3, rtol=2e-3), "mismatch vs JAX reference"

    print("KERNEL_OK")
</pallas_src>

<mosaic_0001>
module attributes {stable_mosaic.version = 11 : i64} {
  func.func @_cmix_kernel(%arg0: i32, %arg1: i32, %arg2: i32, %arg3: memref<1x128xf32, #tpu.memory_space<vmem>>, %arg4: memref<1x8x128xbf16, #tpu.memory_space<vmem>>, %arg5: memref<1x1x8x128xbf16, #tpu.memory_space<vmem>>, %arg6: memref<128x128xbf16, #tpu.memory_space<vmem>>, %arg7: memref<128x128xbf16, #tpu.memory_space<vmem>>, %arg8: memref<1x8x128xf32, #tpu.memory_space<vmem>>, %arg9: memref<8x128xbf16, #tpu.memory_space<vmem>>, %arg10: memref<8x128xf32, #tpu.memory_space<vmem>>) attributes {dimension_semantics = [#tpu.dimension_semantics<parallel>, #tpu.dimension_semantics<parallel>, #tpu.dimension_semantics<arbitrary>], iteration_bounds = array<i64: 2, 1, 1>, scalar_prefetch = 0 : i64, scratch_operands = 2 : i64, tpu.core_type = #tpu.core_type<tc>, window_params = [{pipeline_mode = #tpu.pipeline_mode<synchronous>, transform_indices = @transform_0, window_bounds = array<i64: 1, 128>}, {transform_indices = @transform_1, window_bounds = array<i64: 1, 8, 128>}, {transform_indices = @transform_2, window_bounds = array<i64: 1, 1, 8, 128>}, {transform_indices = @transform_3, window_bounds = array<i64: 128, 128>}, {transform_indices = @transform_4, window_bounds = array<i64: 128, 128>}, {transform_indices = @transform_5, window_bounds = array<i64: 1, 8, 128>}]} {
    %c0_i32 = arith.constant 0 : i32
    %0 = arith.cmpi eq, %arg2, %c0_i32 : i32
    %1 = arith.extui %0 : i1 to i32
    %c0_i32_0 = arith.constant 0 : i32
    %2 = arith.cmpi ne, %1, %c0_i32_0 : i32
    scf.if %2 {
      %c0_14 = arith.constant 0 : index
      %c0_15 = arith.constant 0 : index
      %c0_16 = arith.constant 0 : index
      %18 = vector.load %arg4[%c0_14, %c0_15, %c0_16] : memref<1x8x128xbf16, #tpu.memory_space<vmem>>, vector<1x8x128xbf16>
      %19 = vector.shape_cast %18 : vector<1x8x128xbf16> to vector<8x128xbf16>
      %20 = arith.extf %19 : vector<8x128xbf16> to vector<8x128xf32>
      %c0_17 = arith.constant 0 : index
      %c0_18 = arith.constant 0 : index
      %c0_19 = arith.constant 0 : index
      %c0_20 = arith.constant 0 : index
      %21 = vector.load %arg5[%c0_17, %c0_18, %c0_19, %c0_20] : memref<1x1x8x128xbf16, #tpu.memory_space<vmem>>, vector<1x1x8x128xbf16>
      %22 = vector.extract_strided_slice %21 {offsets = [0, 0, 0, 0], sizes = [1, 1, 1, 128], strides = [1, 1, 1, 1]} : vector<1x1x8x128xbf16> to vector<1x1x1x128xbf16>
      %23 = vector.shape_cast %22 : vector<1x1x1x128xbf16> to vector<1x128xbf16>
      %24 = arith.extf %23 : vector<1x128xbf16> to vector<1x128xf32>
      %c1_i32 = arith.constant 1 : i32
      %25 = tpu.dynamic_rotate %20 by %c1_i32 dim 0 : vector<8x128xf32>, i32 -> vector<8x128xf32>
      %26 = tpu.iota {dimensions = array<i32: 0>} : vector<8x128xi32>
      %c0_i32_21 = arith.constant 0 : i32
      %27 = vector.broadcast %c0_i32_21 : i32 to vector<8x128xi32>
      %28 = arith.cmpi eq, %26, %27 : vector<8x128xi32>
      %29 = vector.shape_cast %24 : vector<1x128xf32> to vector<1x128xf32>
      %30 = vector.broadcast %29 : vector<1x128xf32> to vector<8x128xf32>
      %31 = arith.select %28, %30, %25 : vector<8x128xi1>, vector<8x128xf32>
      %c0_22 = arith.constant 0 : index
      %c0_23 = arith.constant 0 : index
      %32 = vector.load %arg3[%c0_22, %c0_23] : memref<1x128xf32, #tpu.memory_space<vmem>>, vector<1x128xf32>
      %33 = arith.subf %31, %20 : vector<8x128xf32>
      %34 = vector.broadcast %32 : vector<1x128xf32> to vector<8x128xf32>
      %35 = arith.mulf %33, %34 : vector<8x128xf32>
      %36 = arith.addf %20, %35 : vector<8x128xf32>
      %37 = arith.truncf %36 : vector<8x128xf32> to vector<8x128xbf16>
      %c0_24 = arith.constant 0 : index
      %c0_25 = arith.constant 0 : index
      %38 = vector.load %arg9[%c0_24, %c0_25] : memref<8x128xbf16, #tpu.memory_space<vmem>>, vector<8x128xbf16>
      tpu.vector_store %arg9[%c0_24, %c0_25], %37 {strides = array<i32>} : memref<8x128xbf16, #tpu.memory_space<vmem>>, vector<8x128xbf16>,
      %cst_26 = arith.constant 0.000000e+00 : f32
      %39 = vector.broadcast %cst_26 : f32 to vector<8x128xf32>
      %c0_27 = arith.constant 0 : index
      %c0_28 = arith.constant 0 : index
      %40 = vector.load %arg10[%c0_27, %c0_28] : memref<8x128xf32, #tpu.memory_space<vmem>>, vector<8x128xf32>
      tpu.vector_store %arg10[%c0_27, %c0_28], %39 {strides = array<i32>} : memref<8x128xf32, #tpu.memory_space<vmem>>, vector<8x128xf32>,
    } else {
    }
    %c0 = arith.constant 0 : index
    %c0_1 = arith.constant 0 : index
    %3 = vector.load %arg9[%c0, %c0_1] : memref<8x128xbf16, #tpu.memory_space<vmem>>, vector<8x128xbf16>
    %c0_2 = arith.constant 0 : index
    %c0_3 = arith.constant 0 : index
    %4 = vector.load %arg6[%c0_2, %c0_3] : memref<128x128xbf16, #tpu.memory_space<vmem>>, vector<128x128xbf16>
    %cst = arith.constant dense<0.000000e+00> : vector<8x128xf32>
    %5 = tpu.matmul %3, %4, %cst {dimension_numbers = #tpu.dot_dimension_numbers<[1], [0], [0], [1], [0, 0, 1, 1], [], []>} : vector<8x128xbf16>, vector<128x128xbf16>, vector<8x128xf32> -> vector<8x128xf32>
    %cst_4 = arith.constant 0.000000e+00 : f32
    %6 = vector.broadcast %cst_4 : f32 to vector<8x128xf32>
    %7 = arith.maximumf %5, %6 : vector<8x128xf32>
    %8 = arith.mulf %7, %7 : vector<8x128xf32>
    %c0_5 = arith.constant 0 : index
    %c0_6 = arith.constant 0 : index
    %9 = vector.load %arg10[%c0_5, %c0_6] : memref<8x128xf32, #tpu.memory_space<vmem>>, vector<8x128xf32>
    %10 = arith.truncf %8 : vector<8x128xf32> to vector<8x128xbf16>
    %c0_7 = arith.constant 0 : index
    %c0_8 = arith.constant 0 : index
    %11 = vector.load %arg7[%c0_7, %c0_8] : memref<128x128xbf16, #tpu.memory_space<vmem>>, vector<128x128xbf16>
    %cst_9 = arith.constant dense<0.000000e+00> : vector<8x128xf32>
    %12 = tpu.matmul %10, %11, %cst_9 {dimension_numbers = #tpu.dot_dimension_numbers<[1], [0], [0], [1], [0, 0, 1, 1], [], []>} : vector<8x128xbf16>, vector<128x128xbf16>, vector<8x128xf32> -> vector<8x128xf32>
    %13 = arith.addf %9, %12 : vector<8x128xf32>
    %c0_10 = arith.constant 0 : index
    %c0_11 = arith.constant 0 : index
    %14 = vector.load %arg10[%c0_10, %c0_11] : memref<8x128xf32, #tpu.memory_space<vmem>>, vector<8x128xf32>
    tpu.vector_store %arg10[%c0_10, %c0_11], %13 {strides = array<i32>} : memref<8x128xf32, #tpu.memory_space<vmem>>, vector<8x128xf32>,
    %c0_i32_12 = arith.constant 0 : i32
    %15 = arith.cmpi eq, %arg2, %c0_i32_12 : i32
    %16 = arith.extui %15 : i1 to i32
    %c0_i32_13 = arith.constant 0 : i32
    %17 = arith.cmpi ne, %16, %c0_i32_13 : i32
    scf.if %17 {
      %c0_14 = arith.constant 0 : index
      %c0_15 = arith.constant 0 : index
      %18 = vector.load %arg10[%c0_14, %c0_15] : memref<8x128xf32, #tpu.memory_space<vmem>>, vector<8x128xf32>
      %c0_16 = arith.constant 0 : index
      %c0_17 = arith.constant 0 : index
      %c0_18 = arith.constant 0 : index
      %19 = vector.load %arg8[%c0_16, %c0_17, %c0_18] : memref<1x8x128xf32, #tpu.memory_space<vmem>>, vector<1x8x128xf32>
      %20 = vector.shape_cast %19 : vector<1x8x128xf32> to vector<8x128xf32>
      %21 = vector.shape_cast %18 : vector<8x128xf32> to vector<1x8x128xf32>
      tpu.vector_store %arg8[%c0_16, %c0_17, %c0_18], %21 {strides = array<i32>} : memref<1x8x128xf32, #tpu.memory_space<vmem>>, vector<1x8x128xf32>,
    } else {
    }
    return
  }
  func.func @transform_0(%arg0: i32, %arg1: i32, %arg2: i32) -> (i32, i32) {
    %c0_i32 = arith.constant 0 : i32
    %c0_i32_0 = arith.constant 0 : i32
    %c0_i32_1 = arith.constant 0 : i32
    return %c0_i32, %c0_i32_0 : i32, i32
  }
  func.func @transform_1(%arg0: i32, %arg1: i32, %arg2: i32) -> (i32, i32, i32) {
    %c0_i32 = arith.constant 0 : i32
    %c0_i32_0 = arith.constant 0 : i32
    return %arg0, %arg1, %c0_i32 : i32, i32, i32
  }
  func.func @transform_2(%arg0: i32, %arg1: i32, %arg2: i32) -> (i32, i32, i32, i32) {
    %c0_i32 = arith.constant 0 : i32
    %c0_i32_0 = arith.constant 0 : i32
    %c0_i32_1 = arith.constant 0 : i32
    return %arg0, %arg1, %c0_i32, %c0_i32_0 : i32, i32, i32, i32
  }
  func.func @transform_3(%arg0: i32, %arg1: i32, %arg2: i32) -> (i32, i32) {
    %c0_i32 = arith.constant 0 : i32
    %c0_i32_0 = arith.constant 0 : i32
    return %c0_i32, %arg2 : i32, i32
  }
  func.func @transform_4(%arg0: i32, %arg1: i32, %arg2: i32) -> (i32, i32) {
    %c0_i32 = arith.constant 0 : i32
    %c0_i32_0 = arith.constant 0 : i32
    return %arg2, %c0_i32 : i32, i32
  }
  func.func @transform_5(%arg0: i32, %arg1: i32, %arg2: i32) -> (i32, i32, i32) {
    %c0_i32 = arith.constant 0 : i32
    %c0_i32_0 = arith.constant 0 : i32
    return %arg0, %arg1, %c0_i32 : i32, i32, i32
  }
}

</mosaic_0001>

<bundles_post_ra>
// kernel: rwkv_cmix_x070.1
= control target key start
LH: loop header
LB: loop body
LE: loop exit
PB: predicated region body
PF: predicated region fallthrough
CT: control target
= control target key end

     0   :  { %10 = vsyncpa [#allocation5], 0  ;;  %s1056_s0 = inlined_call_operand.vmem [shape: f32[1,128], index: 0, kind: input, shape index: {}]   ;;  %s1057_s1 = inlined_call_operand.vmem [shape: bf16[2,8,128], index: 1, kind: input, shape index: {}]   ;;  %s1058_s2 = inlined_call_operand.vmem [shape: bf16[2,1,8,128], index: 2, kind: input, shape index: {}]   ;;  %s1059_s3 = inlined_call_operand.vmem [shape: bf16[128,128], index: 3, kind: input, shape index: {}]   ;;  %s1060_s4 = inlined_call_operand.vmem [shape: bf16[128,128], index: 4, kind: input, shape index: {}]   ;;  %s1061_s5 = inlined_call_operand.hbm [shape: f32[2,8,128], index: 5, kind: output, shape index: {}]  }
   0x1   :  { %12 = vsyncpa [#allocation5 + $0x1], 0  ;;  %s905_s18 = smov 0   ;;  %s907_s19 = smov 0  }
   0x2   :  { %s909_s20 = smov 0   ;;  %s911_s21 = smov 0  }
   0x3   :  { %s913_s22 = smov 0   ;;  %s915_s23 = smov 0  }
   0x4 LB: > { %s645_s24 = sadd.s32 4294967295, %s873_s23   ;;  %s646_s25 = sadd.s32 4294967294, %s873_s23   ;;  %s873_s23 = sphi %s915_s23, %s18_s23   ;;  %s869_s22 = sphi %s913_s22, %s1068_s22   ;;  %s865_s21 = sphi %s911_s21, %s1067_s21   ;;  %s861_s20 = sphi %s909_s20, %s1066_s20   ;;  %s857_s19 = sphi %s907_s19, %s1065_s19   ;;  %s853_s18 = sphi %s905_s18, %s1064_s18  }
   0x5   : > { %s37_s26 = sadd.s32 1, %s869_s22  ;;  %s175_s27 = sadd.s32 1, %s861_s20 }
   0x6   : > { %p39_p0 = scmp.ge.s32.totalorder %s37_s26, 2  ;;  %p185_p1 = scmp.ne.s32.totalorder %s861_s20, %s857_s19 }
   0x7   : > { %p186_p2 = scmp.eq.s32.totalorder %s645_s24, 1  ;;  %p191_p3 = scmp.ne.s32.totalorder %s857_s19, %s853_s18 }
   0x8   : > { %s1070_s26 = smov (%p39_p0, %s37_s26), 0  ;;  %p192_p5 = scmp.eq.s32.totalorder %s646_s25, 1 }
   0x9   : > { %p945_p4 = por %p186_p2, %p185_p1  ;;  %s170_s29 = ssub.s32 %s869_s22, %s1070_s26 }
   0xa   : > { %p651_p6 = scmp.ge.s32.totalorder %s873_s23, 1  ;;  %p173_p7 = scmp.eq.s32.totalorder %s170_s29, 0 }
   0xb   : > { %p952_p8 = por %p192_p5, %p191_p3  ;;  %p249_p9 = scmp.lt.s32.totalorder %s873_s23, 3 }
   0xc   : > { %s958_s6 = scalar_select %p173_p7, %s861_s20, %s175_s27  }
   0xd   : > { %p250_p10 = pnand %p651_p6, %p249_p9 }
   0xe   : > { %p295_p11 = scmp.lt.s32.totalorder (!%p250_p10), %s865_s21, 1  ;;  %s292_s25 = sand.u32 (!%p250_p10), 1, %s857_s19  }
   0xf   : > { %253 = sbr.rel (%p250_p10) target bundleno = 318 (0x13e), region = 40  ;;  %s652_s29 = sshll.u32 (!%p250_p10), %s292_s25, 3 }
  0x10   : > { %s294_s10 = scalar_lea.vmem (!%p250_p10), [#allocation4], %s652_s29  ;;  %s510_s13 = scalar_lea.sflag (!%p250_p10), [#allocation5], %s292_s25 }
  0x14   : > { %v730_v0 = vld [vmem:[%s1059_s3 + $0x38] sm:$0xff]  ;;  %v328_v1 = vlaneseq  ;;  %v729_v2 = vld [vmem:[%s1059_s3 + $0x30] sm:$0xff]  ;;  %s296_s11 = scalar_select %p295_p11, %s865_s21, 1  ;;  %v728_v6 = vld [vmem:[%s1059_s3 + $0x28] sm:$0xff] }
  0x15   : > { %408 = vmatpush.bf16.msra.mxu0 %v730_v0  ;;  %v738_v3 = vld [vmem:[%s1060_s4 + $0x38] sm:$0xff]  ;;  %v737_v5 = vld [vmem:[%s1060_s4 + $0x30] sm:$0xff]  ;;  %v736_v13 = vld [vmem:[%s1060_s4 + $0x28] sm:$0xff] }
  0x16   : > { %s653_s14 = sshll.u32 %s296_s11, 2  ;;  %v329_v4 = vshrl.u32 %v328_v1, 7  ;;  %489 = vmatpush.bf16.msra.mxu1 %v738_v3  ;;  %v727_v14 = vld [vmem:[%s1059_s3 + $0x20] sm:$0xff]  ;;  %v726_v19 = vld [vmem:[%s1059_s3 + $0x18] sm:$0xff]  ;;  %v725_v23 = vld [vmem:[%s1059_s3 + $0x10] sm:$0xff]  ;;  %s523_s11 = sshll.u32 %s294_s10, 4  ;;  %s524_s11 = int_to_ptr.vmem [resolvable:$true] %s523_s11 }
  0x17   : > { %s301_s17 = scalar_lea.vmem %s1057_s1, %s653_s14  ;;  %s308_s27 = scalar_lea.vmem %s1058_s2, %s653_s14  ;;  %v794_v15 = vld [vmem:[%s1056_s0] ss:$0 sm:$0xff]  ;;  %v734_v22 = vld [vmem:[%s1060_s4 + $0x18] sm:$0xff]  ;;  %v733_v25 = vld [vmem:[%s1060_s4 + $0x10] sm:$0xff] }
  0x18   : > { %v323_v7 = vld [vmem:[%s301_s17] sm:$0xf]  ;;  %vm330_vm0 = vcmp.eq.s32.totalorder %v329_v4, 0  ;;  %v724_v26 = vld [vmem:[%s1059_s3 + $0x8] sm:$0xff]  ;;  %s815_s17 = scalar_lea.hbm %s1061_s5, 16 }
  0x19   : > { %409 = vmatpush.bf16.msra.mxu0 %v729_v2  ;;  %v325_v8 = vld [vmem:[%s308_s27] sm:$0xf]  ;;  %v324_v9 = vunpack.c.l.bf16 %v323_v7  ;;  %v732_v29 = vld [vmem:[%s1060_s4 + $0x8] sm:$0xff]  ;;  %s720_s27 = sshll.u32 %s865_s21, 3 }
  0x1a   : > { %v326_v10 = vunpack.c.l.bf16 %v325_v8  ;;  %490 = vmatpush.bf16.msra.mxu1 %v737_v5  ;;  %v735_v18 = vld [vmem:[%s1060_s4 + $0x20] sm:$0xff]  ;;  %s521_s9 = scalar_lea.hbm %s1061_s5, %s720_s27 }
  0x1b   : > { %v327_v11 = vrot.slane %v324_v9, 7  ;;  %v723_v27 = vld [vmem:[%s1059_s3] sm:$0xff]  ;;  %s525_s12 = sshll.u32 %s521_s9, 4  ;;  %s526_s12 = int_to_ptr.hbm [resolvable:$true] %s525_s12 }
  0x1c   : > { %v331_v12 = vperm.slane %v326_v10, 0  ;;  %v731_v30 = vld [vmem:[%s1060_s4] sm:$0xff]  ;;  %s809_s14 = sshra.s32 %s526_s12, 4  ;;  %s810_s14 = int_to_ptr.hbm [resolvable:$true] %s809_s14 }
  0x1d   : > { %410 = vmatpush.bf16.msra.mxu0 %v728_v6  ;;  %s811_s15 = scalar_lea.hbm %s810_s14, 8  ;;  %p816_p1 = scmp.lt.s32.totalorder %s810_s14, %s1061_s5 }
  0x1e   : > { %v332_v16 = vsel %vm330_vm0, %v331_v12, %v327_v11  ;;  %491 = vmatpush.bf16.msra.mxu1 %v736_v13  ;;  %p812_p12 = scmp.ne.s32.totalorder %s810_s14, %s811_s15  ;;  %p817_p2 = scmp.lt.s32.totalorder %s815_s17, %s811_s15 }
  0x1f   : > { %v334_v17 = vsub.f32 %v332_v16, %v324_v9 }
  0x20   : > { %p813_p13 = pnand %p812_p12, %p945_p4  ;;  %p818_p3 = por %p817_p2, %p816_p1 }
  0x21   : > { %411 = vmatpush.bf16.msra.mxu0 %v727_v14  ;;  %v338_v20 = vmul.f32 %v794_v15, %v334_v17 }
  0x22   : > { %492 = vmatpush.bf16.msra.mxu1 %v735_v18  ;;  %p814_p0 = pneg %p813_p13 }
  0x23   : > { %v339_v21 = vadd.f32 %v338_v20, %v324_v9 }
  0x24   : > { %p819_p5 = pnand %p818_p3, %p814_p0 }
  0x25   : > { %412 = vmatpush.bf16.msra.mxu0 %v726_v19  ;;  %v340_v24 = vpack.c.bf16 %v339_v21, %v339_v21 }
  0x26   : > { %493 = vmatpush.bf16.msra.mxu1 %v734_v22 }
  0x27   : > { %341 = vst [vmem:[#allocation2] sm:$0xf] %v340_v24 }
  0x29   : > { %413 = vmatpush.bf16.msra.mxu0 %v725_v23 }
  0x2a   : > { %494 = vmatpush.bf16.msra.mxu1 %v733_v25 }
  0x2d   : > { %414 = vmatpush.bf16.msra.mxu0 %v724_v26 }
  0x2e   : > { %v343_v28 = vld [vmem:[#allocation2] sm:$0xf]  ;;  %495 = vmatpush.bf16.msra.mxu1 %v732_v29 }
  0x31   : > { %415 = vmatpush.bf16.msra.mxu0 %v723_v27 }
  0x32   : > { %496 = vmatpush.bf16.msra.mxu1 %v731_v30 }
  0x34   : > { %416 = vmatmul.bf16.vlgmr.msra.gmra.mxu0 %v343_v28 }
  0xb1   : > { %v417_v31 = vpop.f32.mrf.mxu0 }
  0xb2   : > { %v421_v32 = vmax.f32 %v417_v31, 0.0 }
  0xb4   : > { %v422_v33 = vmul.f32 %v421_v32, %v421_v32 }
  0xb6   : > { %v424_v34 = vpack.c.bf16 %v422_v33, %v422_v33 }
  0xb8   : > { %497 = vmatmul.bf16.vlgmr.msra.gmra.mxu1 %v424_v34 }
  0xb9   : > { %v419_v35 = vpop.f32.mrf.mxu0 }
 0x135   : > { %v498_v36 = vpop.f32.mrf.mxu1 }
 0x136   : > { %508 = vst [vmem:[%s294_s10] sm:$0xff] %v498_v36 }
 0x137   : > { %822 = shalt.err (!%p819_p5)
}
 0x138   : > { %739 = dma.vmem_to_hbm [thread:$0]  (%p945_p4), %s524_s11, 128, %s526_s12, %s510_s13  }
 0x13d   : > { %v500_v37 = vpop.f32.mrf.mxu1 }
 0x13e PF: > { %p745_p6 = scmp.ge.s32.totalorder %s873_s23, 2  ;;  %s537_s25 = sand.u32 1, %s853_s18  }
 0x13f   : > { %s538_s29 = scalar_lea.sflag [#allocation5], %s537_s25 }
 0x140   : > { %p742_p7 = pnand %p745_p6, %p952_p8 }
 0x142   : > { %p743_p9 = pneg %p742_p7 }
 0x144   : > { %848 = dma.done.wait (%p743_p9), %s538_s29, 128  }
 0x145   : > { %850 = vsyncadd (%p743_p9), %s538_s29, 4294967168  ;;  %s18_s23 = sadd.s32 1, %s873_s23   ;;  %s1064_s18 = smov %s857_s19 }
 0x146   : > { %p15_p10 = scmp.ge.s32.totalorder %s18_s23, 4   ;;  %s1065_s19 = smov %s861_s20 }
 0x147   : > { %s1066_s20 = smov %s958_s6  ;;  %s1067_s21 = smov %s869_s22 }
 0x148   : > { %s1068_s22 = smov %s1070_s26  ;;  %17 = sbr.rel (!%p15_p10) target bundleno = 4 (0x4), region = 92 }
 0x14d   :  { %544 = vsyncpa [#allocation5], 1 }
 0x14e   :  { %546 = vsyncpa [#allocation5 + $0x1], 1 }

</bundles_post_ra>
